<compile_context>
chip_gen: v7x
topology: tpu7x:2x2x1
jax: 0.10.0
libtpu: 0.0.40
codegen_flags: <defaults>
</compile_context>

<pallas_src>
from typing import NamedTuple

import jax
import jax.numpy as jnp
from jax.experimental import pallas as pl
from jax.experimental.pallas import tpu as pltpu

_HIDDEN = 500            # PyTorch hidden width
_HIDDEN_PAD = 512        # padded hidden width (4 x 128 lanes)
_LANE = 128
_ROW_ALIGN = 16          # bf16 native (16,128) sublane tile -> every batch block aligned
_DEFAULT_BATCH_TILE = 1024
_VMEM_BUDGET = 12 << 20  # per-step working-set budget, safe on v5e/v6e/v7x


def _round_up(n: int, m: int) -> int:
    return ((n + m - 1) // m) * m


class PreparedWeights(NamedTuple):
    """One-time prepared weights: (in, out) layout, zero-padded, bf16."""
    w1t: jax.Array       # (in_pad, 512)
    w2t: jax.Array       # (512, 512)
    w3t: jax.Array       # (512, out_pad)
    input_dim: int
    latent_dim: int


def prepare_weights(w1, w2, w3) -> PreparedWeights:
    """Hoisted weight prep. Call once, reuse the result for every forward.

    w1: (500, input_dim)   PyTorch nn.Linear layout (out, in)
    w2: (500, 500)
    w3: (latent_dim, 500)
    """
    hidden, input_dim = w1.shape
    latent_dim = w3.shape[0]
    assert hidden == _HIDDEN, w1.shape
    assert w2.shape == (_HIDDEN, _HIDDEN), w2.shape
    assert w3.shape == (latent_dim, _HIDDEN), w3.shape

    in_pad = _round_up(input_dim, _LANE)
    out_pad = _round_up(latent_dim, _LANE)

    def pad_t(w, rows, cols):
        # Transpose to (in, out), zero-pad.  Zero rows/cols keep the valid
        # region bit-identical (zero inputs x anything = 0; relu(0) = 0).
        buf = jnp.zeros((rows, cols), jnp.float32)
        buf = buf.at[: w.shape[1], : w.shape[0]].set(w.T.astype(jnp.float32))
        return buf.astype(jnp.bfloat16)

    return PreparedWeights(
        w1t=pad_t(w1, in_pad, _HIDDEN_PAD),
        w2t=pad_t(w2, _HIDDEN_PAD, _HIDDEN_PAD),
        w3t=pad_t(w3, _HIDDEN_PAD, out_pad),
        input_dim=input_dim,
        latent_dim=latent_dim,
    )


def _select_batch_tiling(b, batch_tile, in_pad, out_pad, out_bytes,
                         *, vmem_budget=_VMEM_BUDGET, min_steps=2):
    """Pick (tb, grid_n, b_pad, vmem_estimate).

    - tb large enough to amortize per-step overhead, but capped by the VMEM budget.
    - >= `min_steps` grid steps when the batch allows (v7x megacore split).
    - tb chosen from cdiv so ragged batches waste at most one _ROW_ALIGN of rows.
    """
    b_min = _round_up(b, _ROW_ALIGN)

    # VMEM budget: weights (double-buffered by default) + per-row tile costs.
    weight_bytes = 2 * 2 * (in_pad * _HIDDEN_PAD
                            + _HIDDEN_PAD * _HIDDEN_PAD
                            + _HIDDEN_PAD * out_pad)
    per_row = (2 * in_pad * 2              # double-buffered bf16 x tile
               + 2 * out_pad * out_bytes   # double-buffered output tile
               + _HIDDEN_PAD * 12)         # f32 + bf16 h1/h2 compiler temporaries
    tb_cap = max(_ROW_ALIGN,
                 ((vmem_budget - weight_bytes) // per_row) // _ROW_ALIGN * _ROW_ALIGN)
    batch_tile = max(_ROW_ALIGN, min(batch_tile, tb_cap))

    want_steps = max(1, min(min_steps, b_min // _ROW_ALIGN))
    grid_n = max(pl.cdiv(b_min, batch_tile), want_steps)
    tb = _round_up(pl.cdiv(b_min, grid_n), _ROW_ALIGN)
    grid_n = pl.cdiv(b_min, tb)
    b_pad = grid_n * tb

    vmem_est = weight_bytes + tb * per_row
    return tb, grid_n, b_pad, vmem_est


def _mlp_kernel(x_ref, w1_ref, w2_ref, w3_ref, o_ref):
    """Fused 3-layer MLP: relu(relu(relu(x @ W1) @ W2) @ W3).

    Operands are bf16 in VMEM, weights laid out (in, out); accumulation is f32
    on the MXU, ReLU on the f32 result, final store is bf16.
    """
    h1 = jnp.dot(x_ref[...], w1_ref[...], preferred_element_type=jnp.float32)
    h1 = jnp.maximum(h1, 0.0).astype(jnp.bfloat16)
    h2 = jnp.dot(h1, w2_ref[...], preferred_element_type=jnp.float32)
    h2 = jnp.maximum(h2, 0.0).astype(jnp.bfloat16)
    h3 = jnp.dot(h2, w3_ref[...], preferred_element_type=jnp.float32)
    o_ref[...] = jnp.maximum(h3, 0.0).astype(o_ref.dtype)


def linear_classifier_forward(x, prepared: PreparedWeights,
                              *, batch_tile=_DEFAULT_BATCH_TILE):
    """Forward pass.

    x        : (B, ...) arbitrary trailing dims; flattened like x.view(x.shape[0], -1)
    prepared : result of prepare_weights(w1, w2, w3)  (hoisted, reusable)
    returns  : (B, latent_dim) float32
    """
    b = x.shape[0]
    x2d = x.reshape(b, -1)
    input_dim, latent_dim = prepared.input_dim, prepared.latent_dim
    assert x2d.shape[1] == input_dim, (x2d.shape, input_dim)

    in_pad = prepared.w1t.shape[0]
    out_pad = prepared.w3t.shape[1]
    out_dtype = jnp.bfloat16
    out_bytes = 2

    tb, grid_n, b_pad, vmem_est = _select_batch_tiling(
        b, batch_tile, in_pad, out_pad, out_bytes)
    vmem_limit = int(min(32 << 20, max(16 << 20, (vmem_est * 3) // 2)))

    # Activations: skip the explicit zero-pad copy when already aligned.
    if (b_pad, in_pad) == (b, input_dim):
        x_p = x2d.astype(jnp.bfloat16)
    else:
        x_p = jnp.pad(x2d.astype(jnp.bfloat16),
                      ((0, b_pad - b), (0, in_pad - input_dim)))

    flops = 2 * b_pad * (in_pad * _HIDDEN_PAD
                         + _HIDDEN_PAD * _HIDDEN_PAD
                         + _HIDDEN_PAD * out_pad)
    bytes_accessed = (x_p.size * 2
                      + prepared.w1t.size * 2 + prepared.w2t.size * 2
                      + prepared.w3t.size * 2
                      + b_pad * out_pad * out_bytes)

    out_padded = pl.pallas_call(
        _mlp_kernel,
        out_shape=jax.ShapeDtypeStruct((b_pad, out_pad), out_dtype),
        grid_spec=pltpu.PrefetchScalarGridSpec(
            num_scalar_prefetch=0,
            grid=(grid_n,),
            in_specs=[
                # Activations: tiled over the batch grid (double-buffered).
                pl.BlockSpec((tb, in_pad), lambda i: (i, 0)),
                # Weights: constant index_map -> resident in VMEM across steps.
                pl.BlockSpec((in_pad, _HIDDEN_PAD), lambda i: (0, 0)),
                pl.BlockSpec((_HIDDEN_PAD, _HIDDEN_PAD), lambda i: (0, 0)),
                pl.BlockSpec((_HIDDEN_PAD, out_pad), lambda i: (0, 0)),
            ],
            # Lane-dense bf16 output slab (out_pad is a multiple of 128).
            out_specs=pl.BlockSpec((tb, out_pad), lambda i: (i, 0)),
        ),
        compiler_params=pltpu.CompilerParams(
            dimension_semantics=("parallel",),
            vmem_limit_bytes=vmem_limit,
        ),
        cost_estimate=pl.CostEstimate(
            flops=flops, transcendentals=0, bytes_accessed=bytes_accessed),
    )(x_p, prepared.w1t, prepared.w2t, prepared.w3t)

    # Slice padded batch rows / latent lanes off; upcast to the module's f32 output.
    return out_padded[:b, :latent_dim].astype(jnp.float32)


def init_params(input_dim: int, latent_dim: int, key):
    """Deterministic synthetic weights; PyTorch nn.Linear shape (out, in)."""
    k1, k2, k3 = jax.random.split(key, 3)
    w1 = jax.random.uniform(
        k1, (_HIDDEN, input_dim), jnp.float32, -1.0, 1.0) / jnp.sqrt(input_dim)
    w2 = jax.random.uniform(
        k2, (_HIDDEN, _HIDDEN), jnp.float32, -1.0, 1.0) / jnp.sqrt(_HIDDEN)
    w3 = jax.random.uniform(
        k3, (latent_dim, _HIDDEN), jnp.float32, -1.0, 1.0) / jnp.sqrt(_HIDDEN)
    return w1, w2, w3


def _reference(x, w1, w2, w3):
    h = x.reshape(x.shape[0], -1).astype(jnp.float32)
    h = jnp.maximum(h @ w1.T, 0.0)
    h = jnp.maximum(h @ w2.T, 0.0)
    h = jnp.maximum(h @ w3.T, 0.0)
    return h


if __name__ == "__main__":
    key = jax.random.PRNGKey(0)
    kx, kp = jax.random.split(key)

    # Time-series-like input: (batch=2, channels=4, length=16) -> flattened dim 64.
    batch, channels, length = 2, 4, 16
    input_dim = channels * length          # 64
    latent_dim = 32

    x = jax.random.normal(kx, (batch, channels, length), dtype=jnp.float32)
    w1, w2, w3 = init_params(input_dim, latent_dim, kp)

    # Weight prep is hoisted: done once, reused for every forward call.
    prepared = prepare_weights(w1, w2, w3)

    out = linear_classifier_forward(x, prepared)
    out = jax.block_until_ready(out)

    ref = _reference(x, w1, w2, w3)
    assert out.shape == (batch, latent_dim), out.shape
    # bf16 MXU inputs + bf16 output store with f32 accumulation -> looser tolerance.
    assert jnp.allclose(out, ref, atol=5e-2, rtol=5e-2), "mismatch vs reference"

    print("KERNEL_OK")
</pallas_src>

<mosaic_0001>
module attributes {stable_mosaic.version = 11 : i64} {
  func.func @_mlp_kernel(%arg0: i32, %arg1: memref<16x128xbf16, #tpu.memory_space<vmem>>, %arg2: memref<128x512xbf16, #tpu.memory_space<vmem>>, %arg3: memref<512x512xbf16, #tpu.memory_space<vmem>>, %arg4: memref<512x128xbf16, #tpu.memory_space<vmem>>, %arg5: memref<16x128xbf16, #tpu.memory_space<vmem>>) attributes {dimension_semantics = [#tpu.dimension_semantics<parallel>], iteration_bounds = array<i64: 1>, scalar_prefetch = 0 : i64, scratch_operands = 0 : i64, tpu.core_type = #tpu.core_type<tc>, window_params = [{transform_indices = @transform_0, window_bounds = array<i64: 16, 128>}, {pipeline_mode = #tpu.pipeline_mode<synchronous>, transform_indices = @transform_1, window_bounds = array<i64: 128, 512>}, {pipeline_mode = #tpu.pipeline_mode<synchronous>, transform_indices = @transform_2, window_bounds = array<i64: 512, 512>}, {pipeline_mode = #tpu.pipeline_mode<synchronous>, transform_indices = @transform_3, window_bounds = array<i64: 512, 128>}, {transform_indices = @transform_4, window_bounds = array<i64: 16, 128>}]} {
    %c0 = arith.constant 0 : index
    %c0_0 = arith.constant 0 : index
    %0 = vector.load %arg1[%c0, %c0_0] : memref<16x128xbf16, #tpu.memory_space<vmem>>, vector<16x128xbf16>
    %c0_1 = arith.constant 0 : index
    %c0_2 = arith.constant 0 : index
    %1 = vector.load %arg2[%c0_1, %c0_2] : memref<128x512xbf16, #tpu.memory_space<vmem>>, vector<128x512xbf16>
    %cst = arith.constant dense<0.000000e+00> : vector<16x512xf32>
    %2 = tpu.matmul %0, %1, %cst {dimension_numbers = #tpu.dot_dimension_numbers<[1], [0], [0], [1], [0, 0, 1, 1], [], []>} : vector<16x128xbf16>, vector<128x512xbf16>, vector<16x512xf32> -> vector<16x512xf32>
    %cst_3 = arith.constant 0.000000e+00 : f32
    %3 = vector.broadcast %cst_3 : f32 to vector<16x512xf32>
    %4 = arith.maximumf %2, %3 : vector<16x512xf32>
    %5 = arith.truncf %4 : vector<16x512xf32> to vector<16x512xbf16>
    %c0_4 = arith.constant 0 : index
    %c0_5 = arith.constant 0 : index
    %6 = vector.load %arg3[%c0_4, %c0_5] : memref<512x512xbf16, #tpu.memory_space<vmem>>, vector<512x512xbf16>
    %cst_6 = arith.constant dense<0.000000e+00> : vector<16x512xf32>
    %7 = tpu.matmul %5, %6, %cst_6 {dimension_numbers = #tpu.dot_dimension_numbers<[1], [0], [0], [1], [0, 0, 1, 1], [], []>} : vector<16x512xbf16>, vector<512x512xbf16>, vector<16x512xf32> -> vector<16x512xf32>
    %cst_7 = arith.constant 0.000000e+00 : f32
    %8 = vector.broadcast %cst_7 : f32 to vector<16x512xf32>
    %9 = arith.maximumf %7, %8 : vector<16x512xf32>
    %10 = arith.truncf %9 : vector<16x512xf32> to vector<16x512xbf16>
    %c0_8 = arith.constant 0 : index
    %c0_9 = arith.constant 0 : index
    %11 = vector.load %arg4[%c0_8, %c0_9] : memref<512x128xbf16, #tpu.memory_space<vmem>>, vector<512x128xbf16>
    %cst_10 = arith.constant dense<0.000000e+00> : vector<16x128xf32>
    %12 = tpu.matmul %10, %11, %cst_10 {dimension_numbers = #tpu.dot_dimension_numbers<[1], [0], [0], [1], [0, 0, 1, 1], [], []>} : vector<16x512xbf16>, vector<512x128xbf16>, vector<16x128xf32> -> vector<16x128xf32>
    %cst_11 = arith.constant 0.000000e+00 : f32
    %13 = vector.broadcast %cst_11 : f32 to vector<16x128xf32>
    %14 = arith.maximumf %12, %13 : vector<16x128xf32>
    %15 = arith.truncf %14 : vector<16x128xf32> to vector<16x128xbf16>
    %c0_12 = arith.constant 0 : index
    %c0_13 = arith.constant 0 : index
    %16 = vector.load %arg5[%c0_12, %c0_13] : memref<16x128xbf16, #tpu.memory_space<vmem>>, vector<16x128xbf16>
    tpu.vector_store %arg5[%c0_12, %c0_13], %15 {strides = array<i32>} : memref<16x128xbf16, #tpu.memory_space<vmem>>, vector<16x128xbf16>,
    return
  }
  func.func @transform_0(%arg0: i32) -> (i32, i32) {
    %c0_i32 = arith.constant 0 : i32
    %c0_i32_0 = arith.constant 0 : i32
    return %arg0, %c0_i32 : i32, i32
  }
  func.func @transform_1(%arg0: i32) -> (i32, i32) {
    %c0_i32 = arith.constant 0 : i32
    %c0_i32_0 = arith.constant 0 : i32
    %c0_i32_1 = arith.constant 0 : i32
    return %c0_i32, %c0_i32_0 : i32, i32
  }
  func.func @transform_2(%arg0: i32) -> (i32, i32) {
    %c0_i32 = arith.constant 0 : i32
    %c0_i32_0 = arith.constant 0 : i32
    %c0_i32_1 = arith.constant 0 : i32
    return %c0_i32, %c0_i32_0 : i32, i32
  }
  func.func @transform_3(%arg0: i32) -> (i32, i32) {
    %c0_i32 = arith.constant 0 : i32
    %c0_i32_0 = arith.constant 0 : i32
    %c0_i32_1 = arith.constant 0 : i32
    return %c0_i32, %c0_i32_0 : i32, i32
  }
  func.func @transform_4(%arg0: i32) -> (i32, i32) {
    %c0_i32 = arith.constant 0 : i32
    %c0_i32_0 = arith.constant 0 : i32
    return %arg0, %c0_i32 : i32, i32
  }
}

</mosaic_0001>

<bundles_post_ra>
// kernel: tpu_custom_call.1
= control target key start
LH: loop header
LB: loop body
LE: loop exit
PB: predicated region body
PF: predicated region fallthrough
CT: control target
= control target key end

     0   :  { %9 = vsyncpa [#allocation3], 0  ;;  %s2469_s0 = inlined_call_operand.hbm [shape: bf16[16,128], index: 0, kind: input, shape index: {}]   ;;  %s2470_s1 = inlined_call_operand.hbm [shape: bf16[128,512], index: 1, kind: input, shape index: {}]   ;;  %s2471_s2 = inlined_call_operand.hbm [shape: bf16[512,512], index: 2, kind: input, shape index: {}]   ;;  %s2472_s3 = inlined_call_operand.hbm [shape: bf16[512,128], index: 3, kind: input, shape index: {}]   ;;  %s2473_s4 = inlined_call_operand.hbm [shape: bf16[16,128], index: 4, kind: output, shape index: {}]  }
   0x1   :  { %10 = vsyncpa [#allocation6], 0 }
   0x2   :  { %11 = vsyncpa [#allocation9], 0 }
   0x3   :  { %12 = vsyncpa [#allocation4], 0  ;;  %s2348_s15 = smov [#allocation5]   ;;  %s2230_s19 = scalar_lea.hbm %s2470_s1, 4096 }
   0x4   :  { %s30_s16 = sshll.u32 %s2348_s15, 4  ;;  %p2231_p0 = scmp.ne.s32.totalorder %s2470_s1, %s2230_s19  ;;  %s31_s16 = int_to_ptr.vmem [resolvable:$true] %s30_s16 }
   0x5   :  { %p2234_p1 = scmp.lt.u32.totalorder %s2230_s19, %s2470_s1 }
   0x7   :  { %p2236_p2 = pnand %p2234_p1, %p2231_p0 }
   0x9   :  { %2239 = shalt.err (!%p2236_p2)
}
   0xa   :  { %s2240_s24 = scalar_lea.vmem %s31_s16, 4096  ;;  %p2245_p4 = scmp.lt.s32.totalorder %s31_s16, %s31_s16 }
   0xb   :  { %p2241_p3 = scmp.ne.s32.totalorder %s31_s16, %s2240_s24  ;;  %p2246_p5 = scmp.lt.s32.totalorder %s2240_s24, %s2240_s24 }
   0xd   :  { %p2247_p6 = por %p2246_p5, %p2245_p4 }
   0xf   :  { %p2248_p7 = pnand %p2247_p6, %p2241_p3 }
  0x11   :  { %2251 = shalt.err (!%p2248_p7)
}
  0x12   :  { %s2349_s25 = smov 256   ;;  %s2350_s26 = smov 16  }
  0x13   :  { %36 = dma.hbm_to_vmem [thread:$0]  %s2470_s1, 4096, %s31_s16, [#allocation6], %s2349_s25, %s2349_s25, %s2350_s26  }
  0x14   :  { %s2351_s29 = smov [#allocation2]   ;;  %s2252_s7 = scalar_lea.hbm %s2469_s0, 128 }
  0x15   :  { %s18_s30 = sshll.u32 %s2351_s29, 4  ;;  %p2253_p8 = scmp.ne.s32.totalorder %s2469_s0, %s2252_s7  ;;  %s19_s30 = int_to_ptr.vmem [resolvable:$true] %s18_s30 }
  0x16   :  { %p2256_p9 = scmp.lt.u32.totalorder %s2252_s7, %s2469_s0 }
  0x18   :  { %p2258_p10 = pnand %p2256_p9, %p2253_p8 }
  0x1a   :  { %2261 = shalt.err (!%p2258_p10)
}
  0x1b   :  { %s2262_s12 = scalar_lea.vmem %s19_s30, 128  ;;  %p2267_p12 = scmp.lt.s32.totalorder %s19_s30, %s19_s30 }
  0x1c   :  { %p2263_p11 = scmp.ne.s32.totalorder %s19_s30, %s2262_s12  ;;  %p2268_p13 = scmp.lt.s32.totalorder %s2262_s12, %s2262_s12 }
  0x1e   :  { %p2269_p0 = por %p2268_p13, %p2267_p12 }
  0x20   :  { %p2270_p1 = pnand %p2269_p0, %p2263_p11 }
  0x22   :  { %2273 = shalt.err (!%p2270_p1)
}
  0x23   :  { %s2352_s1 = smov 64   ;;  %s2353_s13 = smov 4  }
  0x24   :  { %24 = dma.hbm_to_vmem [thread:$0]  %s2469_s0, 128, %s19_s30, [#allocation3], %s2352_s1, %s2352_s1, %s2353_s13  }
  0x25   :  { %s2354_s16 = smov [#allocation7]   ;;  %s2355_s18 = smov [#allocation8]  }
  0x26   :  { %s42_s17 = sshll.u32 %s2354_s16, 4  ;;  %s54_s19 = sshll.u32 %s2355_s18, 4  ;;  %s43_s17 = int_to_ptr.vmem [resolvable:$true] %s42_s17  ;;  %s2413_s19 = int_to_ptr.vmem [resolvable:$true] %s54_s19 }
  0x27   :  { %s2274_s22 = scalar_lea.hbm %s2471_s2, 16384 }
  0x28   :  { %p2275_p2 = scmp.ne.s32.totalorder %s2471_s2, %s2274_s22  ;;  %p2278_p3 = scmp.lt.u32.totalorder %s2274_s22, %s2471_s2 }
  0x2a   :  { %p2280_p4 = pnand %p2278_p3, %p2275_p2 }
  0x2c   :  { %2283 = shalt.err (!%p2280_p4)
}
  0x2d   :  { %s2284_s0 = scalar_lea.vmem %s43_s17, 16384  ;;  %p2289_p6 = scmp.lt.s32.totalorder %s43_s17, %s43_s17 }
  0x2e   :  { %p2285_p5 = scmp.ne.s32.totalorder %s43_s17, %s2284_s0  ;;  %p2290_p7 = scmp.lt.s32.totalorder %s2284_s0, %s2284_s0 }
  0x30   :  { %p2291_p8 = por %p2290_p7, %p2289_p6 }
  0x32   :  { %p2292_p9 = pnand %p2291_p8, %p2285_p5 }
  0x34   :  { %2295 = shalt.err (!%p2292_p9)
}
  0x35   :  { %48 = dma.hbm_to_vmem [thread:$0]  %s2471_s2, 16384, %s43_s17, [#allocation6], %s2349_s25, %s2349_s25, %s2350_s26  }
  0x36   :  { %s2296_s7 = scalar_lea.hbm %s2472_s3, 4096 }
  0x37   :  { %p2297_p10 = scmp.ne.s32.totalorder %s2472_s3, %s2296_s7  ;;  %p2300_p11 = scmp.lt.u32.totalorder %s2296_s7, %s2472_s3 }
  0x39   :  { %p2302_p12 = pnand %p2300_p11, %p2297_p10 }
  0x3b   :  { %2305 = shalt.err (!%p2302_p12)
}
  0x3c   :  { %s2306_s12 = scalar_lea.vmem %s2413_s19, 4096  ;;  %p2311_p0 = scmp.lt.s32.totalorder %s2413_s19, %s2413_s19 }
  0x3d   :  { %p2307_p13 = scmp.ne.s32.totalorder %s2413_s19, %s2306_s12  ;;  %p2312_p1 = scmp.lt.s32.totalorder %s2306_s12, %s2306_s12 }
  0x3f   :  { %p2313_p2 = por %p2312_p1, %p2311_p0 }
  0x41   :  { %p2314_p3 = pnand %p2313_p2, %p2307_p13 }
  0x43   :  { %2317 = shalt.err (!%p2314_p3)
}
  0x44   :  { %60 = dma.hbm_to_vmem [thread:$0]  %s2472_s3, 4096, %s2413_s19, [#allocation9], %s2352_s1, %s2352_s1, %s2353_s13  }
  0x45   :  { %2340 = dma.done.wait [#allocation3], 128  }
  0x46   :  { %2341 = vsyncadd [#allocation3], 4294967168 }
  0x47   :  { %2342 = dma.done.wait [#allocation6], 20480  }
  0x48   :  { %2343 = vsyncadd [#allocation6], 4294946816 }
  0x49   :  { %2344 = dma.done.wait [#allocation9], 4096  }
  0x4a   :  { %2345 = vsyncadd [#allocation9], 4294963200  ;;  %v2356_v0 = vmov 0   ;;  %v1957_v1 = vld [vmem:[#allocation5 + $0x4] ss:$16 sps:$4 sm:$0xff]   ;;  %v1981_v29 = vld [vmem:[#allocation2] sm:$0xff]  }
  0x4b   :  { %306 = vmatprep.mubr.bf16.mxu0 %v2356_v0  ;;  %349 = vmatprep.mubr.bf16.mxu1 %v2356_v0  ;;  %v1959_v2 = vld [vmem:[#allocation5] ss:$16 sps:$4 sm:$0xff]   ;;  %v1960_v3 = vld [vmem:[#allocation5 + $0x24] ss:$16 sps:$4 sm:$0xff]   ;;  %v1982_v10 = vld [vmem:[#allocation5 + $0xc] ss:$16 sps:$4 sm:$0xff]  }
  0x4c   :  { %274 = vmatprep.subr.bf16.mxu0 %v1957_v1  ;;  %v1962_v4 = vld [vmem:[#allocation5 + $0x20] ss:$16 sps:$4 sm:$0xff]   ;;  %v1963_v5 = vld [vmem:[#allocation5 + $0x44] ss:$16 sps:$4 sm:$0xff]   ;;  %v1984_v11 = vld [vmem:[#allocation5 + $0x8] ss:$16 sps:$4 sm:$0xff]   ;;  %317 = vmatprep.subr.bf16.mxu1 %v1982_v10 }
  0x4d   :  { %275 = vmatpush1.bf16.msra.mxu0 %v1959_v2  ;;  %v1965_v6 = vld [vmem:[#allocation5 + $0x40] ss:$16 sps:$4 sm:$0xff]   ;;  %v1966_v7 = vld [vmem:[#allocation5 + $0x64] ss:$16 sps:$4 sm:$0xff]   ;;  %v1985_v12 = vld [vmem:[#allocation5 + $0x2c] ss:$16 sps:$4 sm:$0xff]   ;;  %318 = vmatpush1.bf16.msra.mxu1 %v1984_v11 }
  0x4e   :  { %276 = vmatprep.subr.bf16.mxu0 %v1960_v3  ;;  %v1968_v8 = vld [vmem:[#allocation5 + $0x60] ss:$16 sps:$4 sm:$0xff]   ;;  %v1969_v9 = vld [vmem:[#allocation5 + $0x84] ss:$16 sps:$4 sm:$0xff]   ;;  %v1987_v14 = vld [vmem:[#allocation5 + $0x28] ss:$16 sps:$4 sm:$0xff]   ;;  %319 = vmatprep.subr.bf16.mxu1 %v1985_v12 }
  0x4f   :  { %v1971_v13 = vld [vmem:[#allocation5 + $0x80] ss:$16 sps:$4 sm:$0xff]   ;;  %v1972_v15 = vld [vmem:[#allocation5 + $0xa4] ss:$16 sps:$4 sm:$0xff]   ;;  %v1988_v16 = vld [vmem:[#allocation5 + $0x4c] ss:$16 sps:$4 sm:$0xff]  }
  0x50   :  { %v1974_v17 = vld [vmem:[#allocation5 + $0xa0] ss:$16 sps:$4 sm:$0xff]   ;;  %v1990_v18 = vld [vmem:[#allocation5 + $0x48] ss:$16 sps:$4 sm:$0xff]   ;;  %v1975_v19 = vld [vmem:[#allocation5 + $0xc4] ss:$16 sps:$4 sm:$0xff]  }
  0x51   :  { %277 = vmatpush1.bf16.msra.mxu0 %v1962_v4  ;;  %320 = vmatpush1.bf16.msra.mxu1 %v1987_v14  ;;  %v1991_v20 = vld [vmem:[#allocation5 + $0x6c] ss:$16 sps:$4 sm:$0xff]   ;;  %v1977_v21 = vld [vmem:[#allocation5 + $0xc0] ss:$16 sps:$4 sm:$0xff]   ;;  %v1993_v22 = vld [vmem:[#allocation5 + $0x68] ss:$16 sps:$4 sm:$0xff]  }
  0x52   :  { %278 = vmatprep.subr.bf16.mxu0 %v1963_v5  ;;  %321 = vmatprep.subr.bf16.mxu1 %v1988_v16  ;;  %v1978_v23 = vld [vmem:[#allocation5 + $0xe4] ss:$16 sps:$4 sm:$0xff]   ;;  %v1994_v24 = vld [vmem:[#allocation5 + $0x8c] ss:$16 sps:$4 sm:$0xff]   ;;  %v1980_v25 = vld [vmem:[#allocation5 + $0xe0] ss:$16 sps:$4 sm:$0xff]  }
  0x53   :  { %v1996_v26 = vld [vmem:[#allocation5 + $0x88] ss:$16 sps:$4 sm:$0xff]   ;;  %v1997_v27 = vld [vmem:[#allocation5 + $0xac] ss:$16 sps:$4 sm:$0xff]   ;;  %v2008_v28 = vld [vmem:[#allocation7 + $0x4] ss:$16 sps:$4 sm:$0xff]  }
  0x54   :  { %v1999_v30 = vld [vmem:[#allocation5 + $0xa8] ss:$16 sps:$4 sm:$0xff]   ;;  %v2006_v31 = vld [vmem:[#allocation7] ss:$16 sps:$4 sm:$0xff]   ;;  %v2000_v32 = vld [vmem:[#allocation5 + $0xcc] ss:$16 sps:$4 sm:$0xff]  }
  0x55   :  { %279 = vmatpush1.bf16.msra.mxu0 %v1965_v6  ;;  %322 = vmatpush1.bf16.msra.mxu1 %v1990_v18  ;;  %v2014_v33 = vld [vmem:[#allocation7 + $0x24] ss:$16 sps:$4 sm:$0xff]   ;;  %v2002_v34 = vld [vmem:[#allocation5 + $0xc8] ss:$16 sps:$4 sm:$0xff]   ;;  %v2012_v35 = vld [vmem:[#allocation7 + $0x20] ss:$16 sps:$4 sm:$0xff]  }
  0x56   :  { %280 = vmatprep.subr.bf16.mxu0 %v1966_v7  ;;  %323 = vmatprep.subr.bf16.mxu1 %v1991_v20  ;;  %v2003_v36 = vld [vmem:[#allocation5 + $0xec] ss:$16 sps:$4 sm:$0xff]   ;;  %v2020_v37 = vld [vmem:[#allocation7 + $0x44] ss:$16 sps:$4 sm:$0xff]   ;;  %v2005_v38 = vld [vmem:[#allocation5 + $0xe8] ss:$16 sps:$4 sm:$0xff]  }
  0x57   :  { %v2018_v39 = vld [vmem:[#allocation7 + $0x40] ss:$16 sps:$4 sm:$0xff]   ;;  %v2011_v40 = vld [vmem:[#allocation7 + $0xc] ss:$16 sps:$4 sm:$0xff]   ;;  %v2026_v41 = vld [vmem:[#allocation7 + $0x64] ss:$16 sps:$4 sm:$0xff]  }
  0x58   :  { %v2009_v42 = vld [vmem:[#allocation7 + $0x8] ss:$16 sps:$4 sm:$0xff]   ;;  %v2024_v43 = vld [vmem:[#allocation7 + $0x60] ss:$16 sps:$4 sm:$0xff]   ;;  %v2017_v44 = vld [vmem:[#allocation7 + $0x2c] ss:$16 sps:$4 sm:$0xff]  }
  0x59   :  { %281 = vmatpush1.bf16.msra.mxu0 %v1968_v8  ;;  %324 = vmatpush1.bf16.msra.mxu1 %v1993_v22  ;;  %v2032_v45 = vld [vmem:[#allocation7 + $0x84] ss:$16 sps:$4 sm:$0xff]   ;;  %v2015_v46 = vld [vmem:[#allocation7 + $0x28] ss:$16 sps:$4 sm:$0xff]   ;;  %v2030_v47 = vld [vmem:[#allocation7 + $0x80] ss:$16 sps:$4 sm:$0xff]  }
  0x5a   :  { %282 = vmatprep.subr.bf16.mxu0 %v1969_v9  ;;  %325 = vmatprep.subr.bf16.mxu1 %v1994_v24  ;;  %v2023_v48 = vld [vmem:[#allocation7 + $0x4c] ss:$16 sps:$4 sm:$0xff]   ;;  %v2038_v49 = vld [vmem:[#allocation7 + $0xa4] ss:$16 sps:$4 sm:$0xff]   ;;  %v2021_v50 = vld [vmem:[#allocation7 + $0x48] ss:$16 sps:$4 sm:$0xff]  }
  0x5b   :  { %v2036_v51 = vld [vmem:[#allocation7 + $0xa0] ss:$16 sps:$4 sm:$0xff]   ;;  %v2029_v52 = vld [vmem:[#allocation7 + $0x6c] ss:$16 sps:$4 sm:$0xff]   ;;  %v2044_v53 = vld [vmem:[#allocation7 + $0xc4] ss:$16 sps:$4 sm:$0xff]  }
  0x5c   :  { %v2027_v54 = vld [vmem:[#allocation7 + $0x68] ss:$16 sps:$4 sm:$0xff]   ;;  %v2042_v55 = vld [vmem:[#allocation7 + $0xc0] ss:$16 sps:$4 sm:$0xff]   ;;  %v2035_v56 = vld [vmem:[#allocation7 + $0x8c] ss:$16 sps:$4 sm:$0xff]  }
  0x5d   :  { %283 = vmatpush1.bf16.msra.mxu0 %v1971_v13  ;;  %326 = vmatpush1.bf16.msra.mxu1 %v1996_v26  ;;  %v2050_v57 = vld [vmem:[#allocation7 + $0xe4] ss:$16 sps:$4 sm:$0xff]   ;;  %v2033_v58 = vld [vmem:[#allocation7 + $0x88] ss:$16 sps:$4 sm:$0xff]   ;;  %v2041_v59 = vld [vmem:[#allocation7 + $0xac] ss:$16 sps:$4 sm:$0xff]  }
  0x5e   :  { %284 = vmatprep.subr.bf16.mxu0 %v1972_v15  ;;  %327 = vmatprep.subr.bf16.mxu1 %v1997_v27  ;;  %v2048_v60 = vld [vmem:[#allocation7 + $0xe0] ss:$16 sps:$4 sm:$0xff]   ;;  %v2056_v61 = vld [vmem:[#allocation7 + $0x104] ss:$16 sps:$4 sm:$0xff]   ;;  %v2039_v62 = vld [vmem:[#allocation7 + $0xa8] ss:$16 sps:$4 sm:$0xff]  }
  0x5f   :  { %v2054_v63 = vld [vmem:[#allocation7 + $0x100] ss:$16 sps:$4 sm:$0xff]   ;;  %v2047_v0 = vld [vmem:[#allocation7 + $0xcc] ss:$16 sps:$4 sm:$0xff]   ;;  %v2062_v1 = vld [vmem:[#allocation7 + $0x124] ss:$16 sps:$4 sm:$0xff]  }
  0x60   :  { %v2045_v2 = vld [vmem:[#allocation7 + $0xc8] ss:$16 sps:$4 sm:$0xff]   ;;  %v2060_v3 = vld [vmem:[#allocation7 + $0x120] ss:$16 sps:$4 sm:$0xff]   ;;  %v2053_v4 = vld [vmem:[#allocation7 + $0xec] ss:$16 sps:$4 sm:$0xff]  }
  0x61   :  { %285 = vmatpush1.bf16.msra.mxu0 %v1974_v17  ;;  %328 = vmatpush1.bf16.msra.mxu1 %v1999_v30  ;;  %v2068_v5 = vld [vmem:[#allocation7 + $0x144] ss:$16 sps:$4 sm:$0xff]   ;;  %v2051_v6 = vld [vmem:[#allocation7 + $0xe8] ss:$16 sps:$4 sm:$0xff]   ;;  %v2066_v7 = vld [vmem:[#allocation7 + $0x140] ss:$16 sps:$4 sm:$0xff]  }
  0x62   :  { %286 = vmatprep.subr.bf16.mxu0 %v1975_v19  ;;  %329 = vmatprep.subr.bf16.mxu1 %v2000_v32  ;;  %v2059_v8 = vld [vmem:[#allocation7 + $0x10c] ss:$16 sps:$4 sm:$0xff]   ;;  %v2074_v9 = vld [vmem:[#allocation7 + $0x164] ss:$16 sps:$4 sm:$0xff]   ;;  %v2057_v10 = vld [vmem:[#allocation7 + $0x108] ss:$16 sps:$4 sm:$0xff]  }
  0x63   :  { %v2072_v11 = vld [vmem:[#allocation7 + $0x160] ss:$16 sps:$4 sm:$0xff]   ;;  %v2065_v12 = vld [vmem:[#allocation7 + $0x12c] ss:$16 sps:$4 sm:$0xff]   ;;  %v2080_v13 = vld [vmem:[#allocation7 + $0x184] ss:$16 sps:$4 sm:$0xff]  }
  0x64   :  { %v2063_v14 = vld [vmem:[#allocation7 + $0x128] ss:$16 sps:$4 sm:$0xff]   ;;  %v2078_v15 = vld [vmem:[#allocation7 + $0x180] ss:$16 sps:$4 sm:$0xff]   ;;  %v2071_v16 = vld [vmem:[#allocation7 + $0x14c] ss:$16 sps:$4 sm:$0xff]  }
  0x65   :  { %287 = vmatpush1.bf16.msra.mxu0 %v1977_v21  ;;  %330 = vmatpush1.bf16.msra.mxu1 %v2002_v34  ;;  %v2086_v17 = vld [vmem:[#allocation7 + $0x1a4] ss:$16 sps:$4 sm:$0xff]   ;;  %v2069_v18 = vld [vmem:[#allocation7 + $0x148] ss:$16 sps:$4 sm:$0xff]   ;;  %v2084_v19 = vld [vmem:[#allocation7 + $0x1a0] ss:$16 sps:$4 sm:$0xff]  }
  0x66   :  { %288 = vmatprep.subr.bf16.mxu0 %v1978_v23  ;;  %331 = vmatprep.subr.bf16.mxu1 %v2003_v36  ;;  %v2077_v20 = vld [vmem:[#allocation7 + $0x16c] ss:$16 sps:$4 sm:$0xff]   ;;  %v2075_v21 = vld [vmem:[#allocation7 + $0x168] ss:$16 sps:$4 sm:$0xff]   ;;  %v2092_v26 = vld [vmem:[#allocation7 + $0x1c4] ss:$16 sps:$4 sm:$0xff]  }
  0x67   :  { %v2083_v22 = vld [vmem:[#allocation7 + $0x18c] ss:$16 sps:$4 sm:$0xff]   ;;  %v2081_v23 = vld [vmem:[#allocation7 + $0x188] ss:$16 sps:$4 sm:$0xff]   ;;  %v2098_v30 = vld [vmem:[#allocation7 + $0x1e4] ss:$16 sps:$4 sm:$0xff]  }
  0x68   :  { %v2089_v24 = vld [vmem:[#allocation7 + $0x1ac] ss:$16 sps:$4 sm:$0xff]   ;;  %v2096_v32 = vld [vmem:[#allocation7 + $0x1e0] ss:$16 sps:$4 sm:$0xff]   ;;  %v2104_v34 = vld [vmem:[#allocation7 + $0x204] ss:$16 sps:$4 sm:$0xff]  }
  0x69   :  { %289 = vmatpush1.bf16.msra.mxu0 %v1980_v25  ;;  %332 = vmatpush1.bf16.msra.mxu1 %v2005_v38  ;;  %v2087_v25 = vld [vmem:[#allocation7 + $0x1a8] ss:$16 sps:$4 sm:$0xff]   ;;  %v2095_v27 = vld [vmem:[#allocation7 + $0x1cc] ss:$16 sps:$4 sm:$0xff]   ;;  %s2357_s3 = smov [#allocation10]  }
  0x6a   :  { %1140 = vmatprep.subr.bf16.mxu0 %v2008_v28  ;;  %1226 = vmatprep.subr.bf16.mxu1 %v2011_v40  ;;  %v2090_v28 = vld [vmem:[#allocation7 + $0x1c0] ss:$16 sps:$4 sm:$0xff]   ;;  %s1679_s26 = sshll.u32 %s2357_s3, 4  ;;  %s1680_s26 = int_to_ptr.vmem [resolvable:$true] %s1679_s26 }
  0x6b   :  { %s2318_s14 = scalar_lea.vmem %s1680_s26, 128  ;;  %p2323_p5 = scmp.lt.s32.totalorder %s1680_s26, %s1680_s26 }
  0x6c   :  { %307 = vmatmul.mubr.bf16.vlgmr.msra.gmra.mrb[0].mxu0 %v1981_v29  ;;  %350 = vmatmul.mubr.bf16.vlgmr.msra.gmra.mrb[0].mxu1 %v1981_v29  ;;  %v2093_v29 = vld [vmem:[#allocation7 + $0x1c8] ss:$16 sps:$4 sm:$0xff]   ;;  %p2319_p4 = scmp.ne.s32.totalorder %s1680_s26, %s2318_s14  ;;  %p2324_p6 = scmp.lt.s32.totalorder %s2318_s14, %s2318_s14 }
  0x6d   :  { %1141 = vmatpush1.bf16.msra.mxu0 %v2006_v31  ;;  %1227 = vmatpush1.bf16.msra.mxu1 %v2009_v42  ;;  %v2101_v31 = vld [vmem:[#allocation7 + $0x1ec] ss:$16 sps:$4 sm:$0xff]  }
  0x6e   :  { %1142 = vmatprep.subr.bf16.mxu0 %v2014_v33  ;;  %1228 = vmatprep.subr.bf16.mxu1 %v2017_v44  ;;  %v2099_v33 = vld [vmem:[#allocation7 + $0x1e8] ss:$16 sps:$4 sm:$0xff]   ;;  %p2325_p7 = por %p2324_p6, %p2323_p5 }
  0x70   :  { %p2326_p8 = pnand %p2325_p7, %p2319_p4 }
  0x71   :  { %1143 = vmatpush1.bf16.msra.mxu0 %v2012_v35  ;;  %1229 = vmatpush1.bf16.msra.mxu1 %v2015_v46  ;;  %v2107_v35 = vld [vmem:[#allocation7 + $0x20c] ss:$16 sps:$4 sm:$0xff]   ;;  %v2102_v46 = vld [vmem:[#allocation7 + $0x200] ss:$16 sps:$4 sm:$0xff]  }
  0x72   :  { %1144 = vmatprep.subr.bf16.mxu0 %v2020_v37  ;;  %1230 = vmatprep.subr.bf16.mxu1 %v2023_v48  ;;  %v2110_v48 = vld [vmem:[#allocation7 + $0x224] ss:$16 sps:$4 sm:$0xff]  }
  0x75   :  { %1145 = vmatpush1.bf16.msra.mxu0 %v2018_v39  ;;  %1231 = vmatpush1.bf16.msra.mxu1 %v2021_v50  ;;  %v2108_v50 = vld [vmem:[#allocation7 + $0x220] ss:$16 sps:$4 sm:$0xff]  }
  0x76   :  { %1146 = vmatprep.subr.bf16.mxu0 %v2026_v41  ;;  %1232 = vmatprep.subr.bf16.mxu1 %v2029_v52  ;;  %v2116_v52 = vld [vmem:[#allocation7 + $0x244] ss:$16 sps:$4 sm:$0xff]  }
  0x79   :  { %1147 = vmatpush1.bf16.msra.mxu0 %v2024_v43  ;;  %1233 = vmatpush1.bf16.msra.mxu1 %v2027_v54 }
  0x7a   :  { %1148 = vmatprep.subr.bf16.mxu0 %v2032_v45  ;;  %1234 = vmatprep.subr.bf16.mxu1 %v2035_v56 }
  0x7d   :  { %1149 = vmatpush1.bf16.msra.mxu0 %v2030_v47  ;;  %1235 = vmatpush1.bf16.msra.mxu1 %v2033_v58  ;;  %v2105_v47 = vld [vmem:[#allocation7 + $0x208] ss:$16 sps:$4 sm:$0xff]  }
  0x7e   :  { %1150 = vmatprep.subr.bf16.mxu0 %v2038_v49  ;;  %1236 = vmatprep.subr.bf16.mxu1 %v2041_v59  ;;  %v2113_v49 = vld [vmem:[#allocation7 + $0x22c] ss:$16 sps:$4 sm:$0xff]   ;;  %v2117_v58 = vld [vmem:[#allocation7 + $0x248] ss:$16 sps:$4 sm:$0xff]  }
  0x81   :  { %1151 = vmatpush1.bf16.msra.mxu0 %v2036_v51  ;;  %1237 = vmatpush1.bf16.msra.mxu1 %v2039_v62  ;;  %v2111_v51 = vld [vmem:[#allocation7 + $0x228] ss:$16 sps:$4 sm:$0xff]   ;;  %v2125_v62 = vld [vmem:[#allocation7 + $0x26c] ss:$16 sps:$4 sm:$0xff]  }
  0x82   :  { %1152 = vmatprep.subr.bf16.mxu0 %v2044_v53  ;;  %1238 = vmatprep.subr.bf16.mxu1 %v2047_v0  ;;  %v2119_v53 = vld [vmem:[#allocation7 + $0x24c] ss:$16 sps:$4 sm:$0xff]  }
  0x85   :  { %1153 = vmatpush1.bf16.msra.mxu0 %v2042_v55  ;;  %1239 = vmatpush1.bf16.msra.mxu1 %v2045_v2 }
  0x86   :  { %1154 = vmatprep.subr.bf16.mxu0 %v2050_v57  ;;  %1240 = vmatprep.subr.bf16.mxu1 %v2053_v4  ;;  %v2114_v57 = vld [vmem:[#allocation7 + $0x240] ss:$16 sps:$4 sm:$0xff]   ;;  %v2123_v4 = vld [vmem:[#allocation7 + $0x268] ss:$16 sps:$4 sm:$0xff]  }
  0x89   :  { %1155 = vmatpush1.bf16.msra.mxu0 %v2048_v60  ;;  %1241 = vmatpush1.bf16.msra.mxu1 %v2051_v6  ;;  %v2128_v6 = vld [vmem:[#allocation7 + $0x284] ss:$16 sps:$4 sm:$0xff]  }
  0x8a   :  { %1156 = vmatprep.subr.bf16.mxu0 %v2056_v61  ;;  %1242 = vmatprep.subr.bf16.mxu1 %v2059_v8  ;;  %v2122_v61 = vld [vmem:[#allocation7 + $0x264] ss:$16 sps:$4 sm:$0xff]   ;;  %v2126_v8 = vld [vmem:[#allocation7 + $0x280] ss:$16 sps:$4 sm:$0xff]  }
  0x8d   :  { %1157 = vmatpush1.bf16.msra.mxu0 %v2054_v63  ;;  %1243 = vmatpush1.bf16.msra.mxu1 %v2057_v10  ;;  %v2134_v10 = vld [vmem:[#allocation7 + $0x2a4] ss:$16 sps:$4 sm:$0xff]  }
  0x8e   :  { %1158 = vmatprep.subr.bf16.mxu0 %v2062_v1  ;;  %1244 = vmatprep.subr.bf16.mxu1 %v2065_v12  ;;  %v2132_v12 = vld [vmem:[#allocation7 + $0x2a0] ss:$16 sps:$4 sm:$0xff]  }
  0x91   :  { %1159 = vmatpush1.bf16.msra.mxu0 %v2060_v3  ;;  %1245 = vmatpush1.bf16.msra.mxu1 %v2063_v14  ;;  %v2120_v3 = vld [vmem:[#allocation7 + $0x260] ss:$16 sps:$4 sm:$0xff]   ;;  %v2140_v14 = vld [vmem:[#allocation7 + $0x2c4] ss:$16 sps:$4 sm:$0xff]  }
  0x92   :  { %1160 = vmatprep.subr.bf16.mxu0 %v2068_v5  ;;  %1246 = vmatprep.subr.bf16.mxu1 %v2071_v16  ;;  %v2138_v16 = vld [vmem:[#allocation7 + $0x2c0] ss:$16 sps:$4 sm:$0xff]  }
  0x95   :  { %1161 = vmatpush1.bf16.msra.mxu0 %v2066_v7  ;;  %1247 = vmatpush1.bf16.msra.mxu1 %v2069_v18  ;;  %v2131_v7 = vld [vmem:[#allocation7 + $0x28c] ss:$16 sps:$4 sm:$0xff]   ;;  %v2146_v18 = vld [vmem:[#allocation7 + $0x2e4] ss:$16 sps:$4 sm:$0xff]  }
  0x96   :  { %1162 = vmatprep.subr.bf16.mxu0 %v2074_v9  ;;  %1248 = vmatprep.subr.bf16.mxu1 %v2077_v20  ;;  %v2129_v9 = vld [vmem:[#allocation7 + $0x288] ss:$16 sps:$4 sm:$0xff]   ;;  %v2144_v20 = vld [vmem:[#allocation7 + $0x2e0] ss:$16 sps:$4 sm:$0xff]  }
  0x99   :  { %1163 = vmatpush1.bf16.msra.mxu0 %v2072_v11  ;;  %1249 = vmatpush1.bf16.msra.mxu1 %v2075_v21  ;;  %v2137_v11 = vld [vmem:[#allocation7 + $0x2ac] ss:$16 sps:$4 sm:$0xff]   ;;  %v2147_v21 = vld [vmem:[#allocation7 + $0x2e8] ss:$16 sps:$4 sm:$0xff]  }
  0x9a   :  { %1164 = vmatprep.subr.bf16.mxu0 %v2080_v13  ;;  %1250 = vmatprep.subr.bf16.mxu1 %v2083_v22  ;;  %v2135_v13 = vld [vmem:[#allocation7 + $0x2a8] ss:$16 sps:$4 sm:$0xff]   ;;  %v2152_v22 = vld [vmem:[#allocation7 + $0x304] ss:$16 sps:$4 sm:$0xff]  }
  0x9d   :  { %1165 = vmatpush1.bf16.msra.mxu0 %v2078_v15  ;;  %1251 = vmatpush1.bf16.msra.mxu1 %v2081_v23  ;;  %v2143_v15 = vld [vmem:[#allocation7 + $0x2cc] ss:$16 sps:$4 sm:$0xff]  }
  0x9e   :  { %1166 = vmatprep.subr.bf16.mxu0 %v2086_v17  ;;  %1252 = vmatprep.subr.bf16.mxu1 %v2089_v24  ;;  %v2141_v17 = vld [vmem:[#allocation7 + $0x2c8] ss:$16 sps:$4 sm:$0xff]   ;;  %v2155_v23 = vld [vmem:[#allocation7 + $0x30c] ss:$16 sps:$4 sm:$0xff]   ;;  %v2150_v24 = vld [vmem:[#allocation7 + $0x300] ss:$16 sps:$4 sm:$0xff]  }
  0xa1   :  { %1167 = vmatpush1.bf16.msra.mxu0 %v2084_v19  ;;  %1253 = vmatpush1.bf16.msra.mxu1 %v2087_v25  ;;  %v2149_v19 = vld [vmem:[#allocation7 + $0x2ec] ss:$16 sps:$4 sm:$0xff]   ;;  %v2153_v25 = vld [vmem:[#allocation7 + $0x308] ss:$16 sps:$4 sm:$0xff]  }
  0xa2   :  { %1168 = vmatprep.subr.bf16.mxu0 %v2092_v26  ;;  %1254 = vmatprep.subr.bf16.mxu1 %v2095_v27  ;;  %v2158_v26 = vld [vmem:[#allocation7 + $0x324] ss:$16 sps:$4 sm:$0xff]   ;;  %v2161_v27 = vld [vmem:[#allocation7 + $0x32c] ss:$16 sps:$4 sm:$0xff]  }
  0xa5   :  { %1169 = vmatpush1.bf16.msra.mxu0 %v2090_v28  ;;  %1255 = vmatpush1.bf16.msra.mxu1 %v2093_v29  ;;  %v2156_v28 = vld [vmem:[#allocation7 + $0x320] ss:$16 sps:$4 sm:$0xff]   ;;  %v2159_v29 = vld [vmem:[#allocation7 + $0x328] ss:$16 sps:$4 sm:$0xff]  }
  0xa6   :  { %1170 = vmatprep.subr.bf16.mxu0 %v2098_v30  ;;  %1256 = vmatprep.subr.bf16.mxu1 %v2101_v31  ;;  %v2164_v30 = vld [vmem:[#allocation7 + $0x344] ss:$16 sps:$4 sm:$0xff]   ;;  %v2167_v31 = vld [vmem:[#allocation7 + $0x34c] ss:$16 sps:$4 sm:$0xff]  }
  0xa9   :  { %1171 = vmatpush1.bf16.msra.mxu0 %v2096_v32  ;;  %1257 = vmatpush1.bf16.msra.mxu1 %v2099_v33  ;;  %v2162_v32 = vld [vmem:[#allocation7 + $0x340] ss:$16 sps:$4 sm:$0xff]   ;;  %v2165_v33 = vld [vmem:[#allocation7 + $0x348] ss:$16 sps:$4 sm:$0xff]  }
  0xaa   :  { %1183 = vmatprep.subr.bf16.mxu0 %v2104_v34  ;;  %1269 = vmatprep.subr.bf16.mxu1 %v2107_v35  ;;  %v2170_v34 = vld [vmem:[#allocation7 + $0x364] ss:$16 sps:$4 sm:$0xff]   ;;  %v2173_v35 = vld [vmem:[#allocation7 + $0x36c] ss:$16 sps:$4 sm:$0xff]  }
 0x13f   :  { %v308_v36 = vpop.f32.mrb[0].mxu0  ;;  %v351_v54 = vpop.f32.mrb[0].mxu1 }
 0x140   :  { %v310_v37 = vpop.f32.mrb[1].mxu0  ;;  %v360_v39 = vmax.f32 %v308_v36, 0.0  ;;  %v362_v55 = vmax.f32 %v351_v54, 0.0  ;;  %v353_v56 = vpop.f32.mrb[1].mxu1  ;;  %v2168_v36 = vld [vmem:[#allocation7 + $0x360] ss:$16 sps:$4 sm:$0xff]  }
 0x141   :  { %v312_v38 = vpop.f32.mrb[2].mxu0  ;;  %v361_v42 = vmax.f32 %v310_v37, 0.0  ;;  %v363_v59 = vmax.f32 %v353_v56, 0.0  ;;  %v355_v60 = vpop.f32.mrb[2].mxu1  ;;  %v2171_v37 = vld [vmem:[#allocation7 + $0x368] ss:$16 sps:$4 sm:$0xff]  }
 0x142   :  { %v364_v40 = vmax.f32 %v312_v38, 0.0  ;;  %v314_v41 = vpop.f32.mrb[3].mxu0  ;;  %v366_v63 = vmax.f32 %v355_v60, 0.0  ;;  %v357_v0 = vpop.f32.mrb[3].mxu1  ;;  %v2176_v38 = vld [vmem:[#allocation7 + $0x384] ss:$16 sps:$4 sm:$0xff]  }
 0x143   :  { %v365_v43 = vmax.f32 %v314_v41, 0.0  ;;  %v367_v1 = vmax.f32 %v357_v0, 0.0  ;;  %v2177_v41 = vld [vmem:[#allocation7 + $0x388] ss:$16 sps:$4 sm:$0xff]   ;;  %v2198_v54 = vld [vmem:[#allocation8 + $0x40] sm:$0xff]   ;;  %v2208_v0 = vld [vmem:[#allocation8 + $0x10] sm:$0xff]  }
 0x144   :  { %v368_v44 = vpack.c.bf16 %v364_v40, %v360_v39  ;;  %v2450_v2 = vpack.c.bf16 %v366_v63, %v362_v55  ;;  %v2179_v39 = vld [vmem:[#allocation7 + $0x38c] ss:$16 sps:$4 sm:$0xff]   ;;  %v2174_v40 = vld [vmem:[#allocation7 + $0x380] ss:$16 sps:$4 sm:$0xff]  }
 0x145   :  { %v369_v45 = vpack.c.bf16 %v365_v43, %v361_v42  ;;  %v371_v5 = vpack.c.bf16 %v367_v1, %v363_v59  ;;  %v2182_v42 = vld [vmem:[#allocation7 + $0x3a4] ss:$16 sps:$4 sm:$0xff]   ;;  %v2185_v43 = vld [vmem:[#allocation7 + $0x3ac] ss:$16 sps:$4 sm:$0xff]  }
 0x146   :  { %v2199_v55 = vld [vmem:[#allocation8 + $0xc0] sm:$0xff]   ;;  %v2203_v59 = vld [vmem:[#allocation8 + $0xc8] sm:$0xff]   ;;  %v2207_v63 = vld [vmem:[#allocation8 + $0xd0] sm:$0xff]  }
 0x147   :  { %1172 = vmatprep.mubr.bf16.mxu0 %v369_v45  ;;  %1258 = vmatprep.mubr.bf16.mxu1 %v369_v45  ;;  %v2183_v45 = vld [vmem:[#allocation7 + $0x3a8] ss:$16 sps:$4 sm:$0xff]   ;;  %v2200_v56 = vld [vmem:[#allocation8] sm:$0xff]   ;;  %v2209_v1 = vld [vmem:[#allocation8 + $0x90] sm:$0xff]  }
 0x148   :  { %1173 = vmatmul.mubr.bf16.vlgmr.msra.gmra.mrb[4].mxu0 %v368_v44  ;;  %1259 = vmatmul.mubr.bf16.vlgmr.msra.gmra.mrb[4].mxu1 %v368_v44  ;;  %v2180_v44 = vld [vmem:[#allocation7 + $0x3a0] ss:$16 sps:$4 sm:$0xff]   ;;  %v2204_v60 = vld [vmem:[#allocation8 + $0x8] sm:$0xff]  }
 0x149   :  { %1184 = vmatpush1.bf16.msra.mxu0 %v2102_v46  ;;  %1270 = vmatpush1.bf16.msra.mxu1 %v2105_v47  ;;  %v2188_v46 = vld [vmem:[#allocation7 + $0x3c4] ss:$16 sps:$4 sm:$0xff]   ;;  %v2191_v47 = vld [vmem:[#allocation7 + $0x3cc] ss:$16 sps:$4 sm:$0xff]  }
 0x14a   :  { %1185 = vmatprep.subr.bf16.mxu0 %v2110_v48  ;;  %1271 = vmatprep.subr.bf16.mxu1 %v2113_v49  ;;  %v2186_v48 = vld [vmem:[#allocation7 + $0x3c0] ss:$16 sps:$4 sm:$0xff]   ;;  %v2189_v49 = vld [vmem:[#allocation7 + $0x3c8] ss:$16 sps:$4 sm:$0xff]  }
 0x14b   :  { %1215 = vmatprep.mubr.bf16.mxu0 %v371_v5  ;;  %1301 = vmatprep.mubr.bf16.mxu1 %v371_v5  ;;  %v2212_v5 = vld [vmem:[#allocation8 + $0x18] sm:$0xff]  }
 0x14d   :  { %1186 = vmatpush1.bf16.msra.mxu0 %v2108_v50  ;;  %1272 = vmatpush1.bf16.msra.mxu1 %v2111_v51  ;;  %v2194_v50 = vld [vmem:[#allocation7 + $0x3e4] ss:$16 sps:$4 sm:$0xff]   ;;  %v2197_v51 = vld [vmem:[#allocation7 + $0x3ec] ss:$16 sps:$4 sm:$0xff]  }
 0x14e   :  { %1187 = vmatprep.subr.bf16.mxu0 %v2116_v52  ;;  %1273 = vmatprep.subr.bf16.mxu1 %v2119_v53  ;;  %v2192_v52 = vld [vmem:[#allocation7 + $0x3e0] ss:$16 sps:$4 sm:$0xff]   ;;  %v2195_v53 = vld [vmem:[#allocation7 + $0x3e8] ss:$16 sps:$4 sm:$0xff]  }
 0x151   :  { %1188 = vmatpush1.bf16.msra.mxu0 %v2114_v57  ;;  %1274 = vmatpush1.bf16.msra.mxu1 %v2117_v58  ;;  %v2201_v57 = vld [vmem:[#allocation8 + $0x80] sm:$0xff]   ;;  %v2202_v58 = vld [vmem:[#allocation8 + $0x48] sm:$0xff]  }
 0x152   :  { %1189 = vmatprep.subr.bf16.mxu0 %v2122_v61  ;;  %1275 = vmatprep.subr.bf16.mxu1 %v2125_v62  ;;  %v2205_v61 = vld [vmem:[#allocation8 + $0x88] sm:$0xff]   ;;  %v2206_v62 = vld [vmem:[#allocation8 + $0x50] sm:$0xff]  }
 0x155   :  { %1190 = vmatpush1.bf16.msra.mxu0 %v2120_v3  ;;  %1276 = vmatpush1.bf16.msra.mxu1 %v2123_v4  ;;  %v2210_v3 = vld [vmem:[#allocation8 + $0x58] sm:$0xff]  }
 0x156   :  { %1191 = vmatprep.subr.bf16.mxu0 %v2128_v6  ;;  %1277 = vmatprep.subr.bf16.mxu1 %v2131_v7  ;;  %v2211_v4 = vld [vmem:[#allocation8 + $0xd8] sm:$0xff]   ;;  %v2214_v6 = vld [vmem:[#allocation8 + $0x60] sm:$0xff]  }
 0x157   :  { %v2215_v7 = vld [vmem:[#allocation8 + $0xe0] sm:$0xff]  }
 0x159   :  { %1192 = vmatpush1.bf16.msra.mxu0 %v2126_v8  ;;  %1278 = vmatpush1.bf16.msra.mxu1 %v2129_v9  ;;  %v2216_v8 = vld [vmem:[#allocation8 + $0x20] sm:$0xff]  }
 0x15a   :  { %1193 = vmatprep.subr.bf16.mxu0 %v2134_v10  ;;  %1279 = vmatprep.subr.bf16.mxu1 %v2137_v11  ;;  %v2217_v9 = vld [vmem:[#allocation8 + $0xa0] sm:$0xff]   ;;  %v2218_v10 = vld [vmem:[#allocation8 + $0x68] sm:$0xff]  }
 0x15b   :  { %v2219_v11 = vld [vmem:[#allocation8 + $0xe8] sm:$0xff]  }
 0x15d   :  { %1194 = vmatpush1.bf16.msra.mxu0 %v2132_v12  ;;  %1280 = vmatpush1.bf16.msra.mxu1 %v2135_v13  ;;  %v2220_v12 = vld [vmem:[#allocation8 + $0x28] sm:$0xff]  }
 0x15e   :  { %1195 = vmatprep.subr.bf16.mxu0 %v2140_v14  ;;  %1281 = vmatprep.subr.bf16.mxu1 %v2143_v15  ;;  %v2221_v13 = vld [vmem:[#allocation8 + $0xa8] sm:$0xff]   ;;  %v2222_v14 = vld [vmem:[#allocation8 + $0x70] sm:$0xff]  }
 0x15f   :  { %v2223_v15 = vld [vmem:[#allocation8 + $0xf0] sm:$0xff]  }
 0x161   :  { %1196 = vmatpush1.bf16.msra.mxu0 %v2138_v16  ;;  %1282 = vmatpush1.bf16.msra.mxu1 %v2141_v17  ;;  %v2224_v16 = vld [vmem:[#allocation8 + $0x30] sm:$0xff]  }
 0x162   :  { %1197 = vmatprep.subr.bf16.mxu0 %v2146_v18  ;;  %1283 = vmatprep.subr.bf16.mxu1 %v2149_v19  ;;  %v2225_v17 = vld [vmem:[#allocation8 + $0xb0] sm:$0xff]   ;;  %v2226_v18 = vld [vmem:[#allocation8 + $0x78] sm:$0xff]  }
 0x163   :  { %v2227_v19 = vld [vmem:[#allocation8 + $0xf8] sm:$0xff]  }
 0x165   :  { %1198 = vmatpush1.bf16.msra.mxu0 %v2144_v20  ;;  %1284 = vmatpush1.bf16.msra.mxu1 %v2147_v21  ;;  %v2228_v20 = vld [vmem:[#allocation8 + $0x38] sm:$0xff]  }
 0x166   :  { %1199 = vmatprep.subr.bf16.mxu0 %v2152_v22  ;;  %1285 = vmatprep.subr.bf16.mxu1 %v2155_v23  ;;  %v2229_v21 = vld [vmem:[#allocation8 + $0xb8] sm:$0xff]  }
 0x169   :  { %1200 = vmatpush1.bf16.msra.mxu0 %v2150_v24  ;;  %1286 = vmatpush1.bf16.msra.mxu1 %v2153_v25 }
 0x16a   :  { %1201 = vmatprep.subr.bf16.mxu0 %v2158_v26  ;;  %1287 = vmatprep.subr.bf16.mxu1 %v2161_v27 }
 0x16d   :  { %1202 = vmatpush1.bf16.msra.mxu0 %v2156_v28  ;;  %1288 = vmatpush1.bf16.msra.mxu1 %v2159_v29 }
 0x16e   :  { %1203 = vmatprep.subr.bf16.mxu0 %v2164_v30  ;;  %1289 = vmatprep.subr.bf16.mxu1 %v2167_v31 }
 0x171   :  { %1204 = vmatpush1.bf16.msra.mxu0 %v2162_v32  ;;  %1290 = vmatpush1.bf16.msra.mxu1 %v2165_v33 }
 0x172   :  { %1205 = vmatprep.subr.bf16.mxu0 %v2170_v34  ;;  %1291 = vmatprep.subr.bf16.mxu1 %v2173_v35 }
 0x175   :  { %1206 = vmatpush1.bf16.msra.mxu0 %v2168_v36  ;;  %1292 = vmatpush1.bf16.msra.mxu1 %v2171_v37 }
 0x176   :  { %1207 = vmatprep.subr.bf16.mxu0 %v2176_v38  ;;  %1293 = vmatprep.subr.bf16.mxu1 %v2179_v39 }
 0x179   :  { %1208 = vmatpush1.bf16.msra.mxu0 %v2174_v40  ;;  %1294 = vmatpush1.bf16.msra.mxu1 %v2177_v41 }
 0x17a   :  { %1209 = vmatprep.subr.bf16.mxu0 %v2182_v42  ;;  %1295 = vmatprep.subr.bf16.mxu1 %v2185_v43 }
 0x17d   :  { %1210 = vmatpush1.bf16.msra.mxu0 %v2180_v44  ;;  %1296 = vmatpush1.bf16.msra.mxu1 %v2183_v45 }
 0x17e   :  { %1211 = vmatprep.subr.bf16.mxu0 %v2188_v46  ;;  %1297 = vmatprep.subr.bf16.mxu1 %v2191_v47 }
 0x181   :  { %1212 = vmatpush1.bf16.msra.mxu0 %v2186_v48  ;;  %1298 = vmatpush1.bf16.msra.mxu1 %v2189_v49 }
 0x182   :  { %1213 = vmatprep.subr.bf16.mxu0 %v2194_v50  ;;  %1299 = vmatprep.subr.bf16.mxu1 %v2197_v51 }
 0x185   :  { %1214 = vmatpush1.bf16.msra.mxu0 %v2192_v52  ;;  %1300 = vmatpush1.bf16.msra.mxu1 %v2195_v53 }
 0x186   :  { %1895 = vmatprep.subr.bf16.mxu0 %v2198_v54  ;;  %1917 = vmatprep.subr.bf16.mxu1 %v2199_v55 }
 0x188   :  { %1216 = vmatmul.mubr.bf16.vlgmr.msra.gmra.mrb[4].mxu0 %v2450_v2  ;;  %1302 = vmatmul.mubr.bf16.vlgmr.msra.gmra.mrb[4].mxu1 %v2450_v2  ;;  %v2213_v2 = vld [vmem:[#allocation8 + $0x98] sm:$0xff]  }
 0x189   :  { %1896 = vmatpush3.bf16.msra.mxu0 %v2200_v56  ;;  %1918 = vmatpush3.bf16.msra.mxu1 %v2201_v57 }
 0x18a   :  { %1897 = vmatprep.subr.bf16.mxu0 %v2202_v58  ;;  %1919 = vmatprep.subr.bf16.mxu1 %v2203_v59 }
 0x18d   :  { %1898 = vmatpush3.bf16.msra.mxu0 %v2204_v60  ;;  %1920 = vmatpush3.bf16.msra.mxu1 %v2205_v61 }
 0x18e   :  { %1899 = vmatprep.subr.bf16.mxu0 %v2206_v62  ;;  %1921 = vmatprep.subr.bf16.mxu1 %v2207_v63 }
 0x191   :  { %1900 = vmatpush3.bf16.msra.mxu0 %v2208_v0  ;;  %1922 = vmatpush3.bf16.msra.mxu1 %v2209_v1 }
 0x192   :  { %1901 = vmatprep.subr.bf16.mxu0 %v2210_v3  ;;  %1923 = vmatprep.subr.bf16.mxu1 %v2211_v4 }
 0x195   :  { %1902 = vmatpush3.bf16.msra.mxu0 %v2212_v5  ;;  %1924 = vmatpush3.bf16.msra.mxu1 %v2213_v2 }
 0x196   :  { %1903 = vmatprep.subr.bf16.mxu0 %v2214_v6  ;;  %1925 = vmatprep.subr.bf16.mxu1 %v2215_v7 }
 0x199   :  { %1904 = vmatpush3.bf16.msra.mxu0 %v2216_v8  ;;  %1926 = vmatpush3.bf16.msra.mxu1 %v2217_v9 }
 0x19a   :  { %1905 = vmatprep.subr.bf16.mxu0 %v2218_v10  ;;  %1927 = vmatprep.subr.bf16.mxu1 %v2219_v11 }
 0x19d   :  { %1906 = vmatpush3.bf16.msra.mxu0 %v2220_v12  ;;  %1928 = vmatpush3.bf16.msra.mxu1 %v2221_v13 }
 0x19e   :  { %1907 = vmatprep.subr.bf16.mxu0 %v2222_v14  ;;  %1929 = vmatprep.subr.bf16.mxu1 %v2223_v15 }
 0x1a1   :  { %1908 = vmatpush3.bf16.msra.mxu0 %v2224_v16  ;;  %1930 = vmatpush3.bf16.msra.mxu1 %v2225_v17 }
 0x1a2   :  { %1909 = vmatprep.subr.bf16.mxu0 %v2226_v18  ;;  %1931 = vmatprep.subr.bf16.mxu1 %v2227_v19 }
 0x1a5   :  { %1910 = vmatpush3.bf16.msra.mxu0 %v2228_v20  ;;  %1932 = vmatpush3.bf16.msra.mxu1 %v2229_v21 }
 0x25b   :  { %v1217_v22 = vpop.f32.mrb[4].mxu0  ;;  %v1303_v23 = vpop.f32.mrb[4].mxu1 }
 0x25c   :  { %v1219_v24 = vpop.f32.mrb[5].mxu0  ;;  %v1305_v25 = vpop.f32.mrb[5].mxu1  ;;  %v1312_v28 = vmax.f32 %v1217_v22, 0.0  ;;  %v1314_v29 = vmax.f32 %v1303_v23, 0.0 }
 0x25d   :  { %v1221_v26 = vpop.f32.mrb[6].mxu0  ;;  %v1307_v27 = vpop.f32.mrb[6].mxu1  ;;  %v1313_v34 = vmax.f32 %v1219_v24, 0.0  ;;  %v1315_v35 = vmax.f32 %v1305_v25, 0.0 }
 0x25e   :  { %v1316_v30 = vmax.f32 %v1221_v26, 0.0  ;;  %v1318_v31 = vmax.f32 %v1307_v27, 0.0  ;;  %v1223_v32 = vpop.f32.mrb[7].mxu0  ;;  %v1309_v33 = vpop.f32.mrb[7].mxu1 }
 0x25f   :  { %v1317_v36 = vmax.f32 %v1223_v32, 0.0  ;;  %v1319_v37 = vmax.f32 %v1309_v33, 0.0 }
 0x260   :  { %v1320_v38 = vpack.c.bf16 %v1316_v30, %v1312_v28  ;;  %v1322_v39 = vpack.c.bf16 %v1318_v31, %v1314_v29 }
 0x261   :  { %v1321_v40 = vpack.c.bf16 %v1317_v36, %v1313_v34  ;;  %v1323_v41 = vpack.c.bf16 %v1319_v37, %v1315_v35 }
 0x263   :  { %1612 = vmatprep.mubr.bf16.mxu0 %v1321_v40  ;;  %1653 = vmatprep.mubr.bf16.mxu1 %v1323_v41 }
 0x264   :  { %1613 = vmatmul.mubr.bf16.vlgmr.msra.gmra.mrb[8].mxu0 %v1320_v38  ;;  %1654 = vmatmul.mubr.bf16.vlgmr.msra.gmra.mrb[8].mxu1 %v1322_v39 }
 0x337   :  { %v1911_v42 = vpop.f32.mrb[8].mxu0  ;;  %v1933_v43 = vpop.f32.mrb[8].mxu1 }
 0x338   :  { %v1912_v44 = vpop.f32.mrb[9].mxu0  ;;  %v1934_v45 = vpop.f32.mrb[9].mxu1 }
 0x339   :  { %v1913_v46 = vadd.f32 %v1912_v44, %v1911_v42  ;;  %v1935_v47 = vadd.f32 %v1934_v45, %v1933_v43  ;;  %v1914_v48 = vpop.f32.mrb[10].mxu0  ;;  %v1936_v49 = vpop.f32.mrb[10].mxu1 }
 0x33a   :  { %v1915_v50 = vpop.f32.mrb[11].mxu0  ;;  %v1937_v51 = vpop.f32.mrb[11].mxu1 }
 0x33b   :  { %v1656_v52 = vadd.f32 %v1935_v47, %v1913_v46  ;;  %v1916_v53 = vadd.f32 %v1915_v50, %v1914_v48  ;;  %v1938_v54 = vadd.f32 %v1937_v51, %v1936_v49 }
 0x33d   :  { %v1659_v55 = vadd.f32 %v1938_v54, %v1916_v53  ;;  %v1662_v56 = vmax.f32 %v1656_v52, 0.0 }
 0x33f   :  { %v1663_v57 = vmax.f32 %v1659_v55, 0.0 }
 0x341   :  { %v1893_v58 = vpack.c.bf16 %v1663_v57, %v1662_v56 }
 0x343   :  { %1894 = vst [vmem:[#allocation10] sm:$0xff] %v1893_v58  }
 0x344   :  { %2329 = shalt.err (!%p2326_p8)
}
 0x345   :  { %s2330_s17 = scalar_lea.hbm %s2473_s4, 128 }
 0x346   :  { %p2331_p9 = scmp.ne.s32.totalorder %s2473_s4, %s2330_s17  ;;  %p2334_p10 = scmp.lt.u32.totalorder %s2330_s17, %s2473_s4 }
 0x348   :  { %p2336_p11 = pnand %p2334_p10, %p2331_p9 }
 0x34a   :  { %2339 = shalt.err (!%p2336_p11)
}
 0x34b   :  { %1685 = dma.vmem_to_hbm [thread:$0]  %s1680_s26, 128, %s2473_s4, [#allocation4], %s2352_s1, %s2352_s1, %s2353_s13  }
 0x34c   :  { %2346 = dma.done.wait [#allocation4], 128  }
 0x34d   :  { %2347 = vsyncadd [#allocation4], 4294967168 }
 0x34e   :  { %1689 = vsyncpa [#allocation3], 1 }
 0x34f   :  { %1690 = vsyncpa [#allocation6], 1 }
 0x350   :  { %1691 = vsyncpa [#allocation9], 1 }
 0x351   :  { %1692 = vsyncpa [#allocation4], 1 }

</bundles_post_ra>
